<compile_context>
chip_gen: v5e
topology: v5e:2x2
jax: 0.10.0
libtpu: 0.0.40
codegen_flags: <defaults>
</compile_context>

<pallas_src>
import jax
import jax.numpy as jnp
from jax.experimental import pallas as pl
from jax.experimental.pallas import tpu as pltpu

EPS = 1e-5  # calc_mean_std eps (AdaIN convention)


def _choose_tile(n, preferred=256):
    """Largest 128-aligned tile that divides n (falls back to the full extent)."""
    for t in (preferred, 512, 256, 128):
        if t is not None and 0 < t <= n and n % t == 0:
            return t
    return n


# ---------------------------------------------------------------------------
# Kernel 1: 1x1-conv projection   y = W_eff[b] @ x[b, :, tile] + b_eff[b]
# (instance-norm already folded into W_eff / b_eff by the wrapper)
# ---------------------------------------------------------------------------
def _make_proj_kernel(mxu_dtype):
    def _proj_kernel(x_ref, w_ref, b_ref, o_ref):
        x = x_ref[0].astype(mxu_dtype)                      # (C, t)
        w = w_ref[0].astype(mxu_dtype)                      # (C, C)
        y = jnp.dot(w, x, preferred_element_type=jnp.float32)
        y = y + b_ref[0].astype(jnp.float32)                # (C, 1) broadcast over lanes
        o_ref[0] = y.astype(o_ref.dtype)
    return _proj_kernel


def _project(x, w, b, *, out_dtype, mxu_dtype, tile):
    """x: (B, C, HW); w: (Bw, C, C); b: (Bw, C, 1) with Bw in {1, B}."""
    B, C, HW = x.shape
    Bw = w.shape[0]
    t = tile
    w_idx = (lambda bb, ti: (bb, 0, 0)) if Bw > 1 else (lambda bb, ti: (0, 0, 0))
    return pl.pallas_call(
        _make_proj_kernel(mxu_dtype),
        out_shape=jax.ShapeDtypeStruct((B, C, HW), out_dtype),
        grid_spec=pltpu.PrefetchScalarGridSpec(
            num_scalar_prefetch=0,
            grid=(B, HW // t),
            in_specs=[
                pl.BlockSpec((1, C, t), lambda bb, ti: (bb, 0, ti)),
                pl.BlockSpec((1, C, C), w_idx),
                pl.BlockSpec((1, C, 1), w_idx),
            ],
            out_specs=pl.BlockSpec((1, C, t), lambda bb, ti: (bb, 0, ti)),
        ),
        compiler_params=pltpu.CompilerParams(
            dimension_semantics=("parallel", "parallel")),
    )(x, w, b)


# ---------------------------------------------------------------------------
# Kernel 2: flash-style attention (online softmax), channel-major layout.
#   Q: (B, C, HWc), K/V: (B, C, HWs), O: (B, C, HWc)
# ---------------------------------------------------------------------------
def _make_flash_kernel(approx_recip):
    def _flash_kernel(q_ref, k_ref, v_ref, o_ref, m_sc, l_sc, acc_sc):
        ki = pl.program_id(2)

        @pl.when(ki == 0)
        def _():
            m_sc[...] = jnp.full(m_sc.shape, -jnp.inf, m_sc.dtype)
            l_sc[...] = jnp.zeros(l_sc.shape, l_sc.dtype)
            acc_sc[...] = jnp.zeros(acc_sc.shape, acc_sc.dtype)

        q = q_ref[0]       # (C, tq)   (MXU dtype)
        k = k_ref[0]       # (C, tk)
        v = v_ref[0]       # (C, tk)

        # s[kv, q] = <k[:, kv], q[:, q]>  -- contract the shared channel axis
        # directly (no materialized transposes).  Softmax is over kv (axis 0).
        s = jax.lax.dot_general(k, q, (((0,), (0,)), ((), ())),
                                preferred_element_type=jnp.float32)  # (tk, tq) f32

        m_prev = m_sc[...]                                           # (1, tq)
        m_new = jnp.maximum(m_prev, jnp.max(s, axis=0, keepdims=True))
        alpha = jnp.exp(m_prev - m_new)                              # (1, tq)
        p = jnp.exp(s - m_new)                                       # (tk, tq) f32
        l_sc[...] = alpha * l_sc[...] + jnp.sum(p, axis=0, keepdims=True)
        # acc[c, q] += sum_kv v[c, kv] * p[kv, q]  (f32 accumulate, low-precision operands)
        pv = jnp.dot(v, p.astype(v.dtype), preferred_element_type=jnp.float32)
        acc_sc[...] = alpha * acc_sc[...] + pv
        m_sc[...] = m_new

        @pl.when(ki == pl.num_programs(2) - 1)
        def _():
            inv_l = pl.reciprocal(l_sc[...], approx=approx_recip)    # (1, tq)
            o_ref[0] = (acc_sc[...] * inv_l).astype(o_ref.dtype)
    return _flash_kernel


def _flash_attention(q, k, v, *, out_dtype, tq, tk, approx_recip):
    B, C, HWc = q.shape
    _, _, HWs = k.shape
    nq, nk = HWc // tq, HWs // tk
    return pl.pallas_call(
        _make_flash_kernel(approx_recip),
        out_shape=jax.ShapeDtypeStruct((B, C, HWc), out_dtype),
        grid_spec=pltpu.PrefetchScalarGridSpec(
            num_scalar_prefetch=0,
            grid=(B, nq, nk),
            in_specs=[
                pl.BlockSpec((1, C, tq), lambda b, qi, ki: (b, 0, qi)),
                pl.BlockSpec((1, C, tk), lambda b, qi, ki: (b, 0, ki)),
                pl.BlockSpec((1, C, tk), lambda b, qi, ki: (b, 0, ki)),
            ],
            out_specs=pl.BlockSpec((1, C, tq), lambda b, qi, ki: (b, 0, qi)),
            scratch_shapes=[
                pltpu.VMEM((1, tq), jnp.float32),   # running max   m
                pltpu.VMEM((1, tq), jnp.float32),   # running denom l
                pltpu.VMEM((C, tq), jnp.float32),   # output accumulator
            ],
        ),
        compiler_params=pltpu.CompilerParams(
            dimension_semantics=("parallel", "parallel", "arbitrary")),
    )(q, k, v)


# ---------------------------------------------------------------------------
# Public forward: mirrors the PyTorch module (NCHW in, NCHW out).
# ---------------------------------------------------------------------------
def attention_forward(content_feat, style_feat, wq, bq, wk, bk, wv, bv,
                      *, mxu_dtype=jnp.bfloat16, tq=None, tk=None):
    """mxu_dtype: operand dtype fed to the MXU (bf16 default, f32 accumulation).
    Pass jnp.float32 for bit-faithful f32 math (also uses exact softmax divide)."""
    B, C, Hc, Wc = content_feat.shape
    _, _, Hs, Ws = style_feat.shape
    HWc, HWs = Hc * Wc, Hs * Ws

    c = content_feat.reshape(B, C, HWc)
    s = style_feat.reshape(B, C, HWs)

    # ---- hoisted instance-norm statistics (tiny XLA reduction; ddof=1, eps inside sqrt)
    cf = c.astype(jnp.float32)
    sf = s.astype(jnp.float32)
    c_mean = jnp.mean(cf, axis=2, keepdims=True)
    c_var = jnp.sum((cf - c_mean) ** 2, axis=2, keepdims=True) / max(HWc - 1, 1)
    c_rstd = jax.lax.rsqrt(c_var + EPS)
    s_mean = jnp.mean(sf, axis=2, keepdims=True)
    s_var = jnp.sum((sf - s_mean) ** 2, axis=2, keepdims=True) / max(HWs - 1, 1)
    s_rstd = jax.lax.rsqrt(s_var + EPS)

    # ---- fold normalization into per-batch effective 1x1-conv weights/biases
    wq32, wk32, wv32 = wq.astype(jnp.float32), wk.astype(jnp.float32), wv.astype(jnp.float32)
    bq32, bk32, bv32 = bq.astype(jnp.float32), bk.astype(jnp.float32), bv.astype(jnp.float32)
    wq_eff = wq32[None] * c_rstd.transpose(0, 2, 1)                           # (B, C, C)
    bq_eff = bq32[None] - jnp.einsum('ij,bj->bi', wq32, (c_mean * c_rstd)[..., 0])
    wk_eff = wk32[None] * s_rstd.transpose(0, 2, 1)
    bk_eff = bk32[None] - jnp.einsum('ij,bj->bi', wk32, (s_mean * s_rstd)[..., 0])

    # ---- 1x1-conv projections (Q from content, K/V from style), emitted in MXU dtype
    tp_c = _choose_tile(HWc, 512)
    tp_s = _choose_tile(HWs, 512)
    Q = _project(c, wq_eff, bq_eff[..., None], out_dtype=mxu_dtype,
                 mxu_dtype=mxu_dtype, tile=tp_c)
    K = _project(s, wk_eff, bk_eff[..., None], out_dtype=mxu_dtype,
                 mxu_dtype=mxu_dtype, tile=tp_s)
    V = _project(s, wv32[None], bv32[None, :, None], out_dtype=mxu_dtype,
                 mxu_dtype=mxu_dtype, tile=tp_s)

    # ---- flash attention over spatial tiles
    tq = _choose_tile(HWc, tq or 256)
    tk = _choose_tile(HWs, tk or 256)
    approx = bool(jnp.dtype(mxu_dtype) != jnp.dtype(jnp.float32))
    out = _flash_attention(Q, K, V, out_dtype=content_feat.dtype,
                           tq=tq, tk=tk, approx_recip=approx)
    return out.reshape(B, C, Hc, Wc)


# ---------- deterministic parameter init (mirrors the PyTorch __init__) ----------
def init_params(key, num_features):
    C = num_features
    bound = jnp.sqrt(6.0 / (C + C))          # xavier_uniform_, fan_in = fan_out = C
    keys = jax.random.split(key, 6)
    wq = jax.random.uniform(keys[0], (C, C), jnp.float32, -bound, bound)
    wk = jax.random.uniform(keys[1], (C, C), jnp.float32, -bound, bound)
    wv = jax.random.uniform(keys[2], (C, C), jnp.float32, -bound, bound)
    bq = jax.random.uniform(keys[3], (C,), jnp.float32, 0.0, 1.0)
    bk = jax.random.uniform(keys[4], (C,), jnp.float32, 0.0, 1.0)
    bv = jax.random.uniform(keys[5], (C,), jnp.float32, 0.0, 1.0)
    return wq, bq, wk, bk, wv, bv


# ---------- pure-JAX reference (PyTorch-faithful, for correctness check) ----------
def reference_forward(c, s, wq, bq, wk, bk, wv, bv):
    def norm(x):
        mean = x.mean(axis=(2, 3), keepdims=True)
        var = x.var(axis=(2, 3), keepdims=True, ddof=1)
        return (x - mean) / jnp.sqrt(var + EPS)

    def conv1x1(x, w, b):
        return jnp.einsum('oc,bchw->bohw', w, x) + b[None, :, None, None]

    Q = conv1x1(norm(c), wq, bq)
    K = conv1x1(norm(s), wk, bk)
    V = conv1x1(s, wv, bv)
    B, C, H, W = Q.shape
    Qf = Q.reshape(B, C, -1).transpose(0, 2, 1)
    Kf = K.reshape(K.shape[0], K.shape[1], -1)
    A = jax.nn.softmax(jnp.einsum('bqc,bck->bqk', Qf, Kf), axis=-1)
    Vf = V.reshape(V.shape[0], V.shape[1], -1)
    O = jnp.einsum('bck,bqk->bcq', Vf, A)
    return O.reshape(c.shape)


if __name__ == "__main__":
    key = jax.random.PRNGKey(0)
    k_param, k_c, k_s = jax.random.split(key, 3)

    B, C, H, W = 2, 4, 16, 16
    content = jax.random.normal(k_c, (B, C, H, W), jnp.float32)
    style = jax.random.normal(k_s, (B, C, H, W), jnp.float32)

    wq, bq, wk, bk, wv, bv = init_params(k_param, C)
    ref = reference_forward(content, style, wq, bq, wk, bk, wv, bv)

    # Bit-faithful f32 mode (exact softmax divide): tight check vs the reference.
    # tq=tk=128 -> grid (2, 2, 2): exercises the online-softmax kv loop + parallel axes.
    out_f32 = attention_forward(content, style, wq, bq, wk, bk, wv, bv,
                                mxu_dtype=jnp.float32, tq=128, tk=128)
    out_f32 = jax.block_until_ready(out_f32)
    assert out_f32.shape == (B, C, H, W)
    assert jnp.allclose(out_f32, ref, atol=1e-4, rtol=1e-4), "f32 mismatch vs reference"

    # Default performance mode (bf16 MXU operands, f32 accumulation, approx reciprocal).
    out_bf16 = attention_forward(content, style, wq, bq, wk, bk, wv, bv,
                                 tq=128, tk=128)
    out_bf16 = jax.block_until_ready(out_bf16)
    assert out_bf16.shape == (B, C, H, W)
    assert bool(jnp.isfinite(out_bf16).all())
    rel_err = float(jnp.mean(jnp.abs(out_bf16 - ref)) / (jnp.mean(jnp.abs(ref)) + 1e-6))
    assert rel_err < 0.25, f"bf16 path too far from reference (rel_err={rel_err})"

    print("KERNEL_OK")
</pallas_src>

<mosaic_0001>
module attributes {stable_mosaic.version = 11 : i64} {
  func.func @_proj_kernel(%arg0: i32, %arg1: i32, %arg2: memref<1x4x256xf32, #tpu.memory_space<vmem>>, %arg3: memref<1x4x4xf32, #tpu.memory_space<vmem>>, %arg4: memref<1x4x1xf32, #tpu.memory_space<vmem>>, %arg5: memref<1x4x256xf32, #tpu.memory_space<vmem>>) attributes {dimension_semantics = [#tpu.dimension_semantics<parallel>, #tpu.dimension_semantics<parallel>], iteration_bounds = array<i64: 2, 1>, scalar_prefetch = 0 : i64, scratch_operands = 0 : i64, tpu.core_type = #tpu.core_type<tc>, window_params = [{transform_indices = @transform_0, window_bounds = array<i64: 1, 4, 256>}, {transform_indices = @transform_1, window_bounds = array<i64: 1, 4, 4>}, {transform_indices = @transform_2, window_bounds = array<i64: 1, 4, 1>}, {transform_indices = @transform_3, window_bounds = array<i64: 1, 4, 256>}]} {
    %c0 = arith.constant 0 : index
    %c0_0 = arith.constant 0 : index
    %c0_1 = arith.constant 0 : index
    %0 = vector.load %arg2[%c0, %c0_0, %c0_1] : memref<1x4x256xf32, #tpu.memory_space<vmem>>, vector<1x4x256xf32>
    %1 = vector.shape_cast %0 : vector<1x4x256xf32> to vector<4x256xf32>
    %c0_2 = arith.constant 0 : index
    %c0_3 = arith.constant 0 : index
    %c0_4 = arith.constant 0 : index
    %2 = vector.load %arg3[%c0_2, %c0_3, %c0_4] : memref<1x4x4xf32, #tpu.memory_space<vmem>>, vector<1x4x4xf32>
    %3 = vector.shape_cast %2 : vector<1x4x4xf32> to vector<4x4xf32>
    %cst = arith.constant dense<0.000000e+00> : vector<4x256xf32>
    %4 = tpu.matmul %3, %1, %cst {dimension_numbers = #tpu.dot_dimension_numbers<[1], [0], [0], [1], [0, 0, 1, 1], [], []>} : vector<4x4xf32>, vector<4x256xf32>, vector<4x256xf32> -> vector<4x256xf32>
    %c0_5 = arith.constant 0 : index
    %c0_6 = arith.constant 0 : index
    %c0_7 = arith.constant 0 : index
    %5 = vector.load %arg4[%c0_5, %c0_6, %c0_7] : memref<1x4x1xf32, #tpu.memory_space<vmem>>, vector<1x4x1xf32>
    %6 = vector.shape_cast %5 : vector<1x4x1xf32> to vector<4x1xf32>
    %7 = vector.broadcast %6 : vector<4x1xf32> to vector<4x256xf32>
    %8 = arith.addf %4, %7 : vector<4x256xf32>
    %c0_8 = arith.constant 0 : index
    %c0_9 = arith.constant 0 : index
    %c0_10 = arith.constant 0 : index
    %9 = vector.load %arg5[%c0_8, %c0_9, %c0_10] : memref<1x4x256xf32, #tpu.memory_space<vmem>>, vector<1x4x256xf32>
    %10 = vector.shape_cast %9 : vector<1x4x256xf32> to vector<4x256xf32>
    %11 = vector.shape_cast %8 : vector<4x256xf32> to vector<1x4x256xf32>
    tpu.vector_store %arg5[%c0_8, %c0_9, %c0_10], %11 {strides = array<i32>} : memref<1x4x256xf32, #tpu.memory_space<vmem>>, vector<1x4x256xf32>,
    return
  }
  func.func @transform_0(%arg0: i32, %arg1: i32) -> (i32, i32, i32) {
    %c0_i32 = arith.constant 0 : i32
    %c0_i32_0 = arith.constant 0 : i32
    return %arg0, %c0_i32, %arg1 : i32, i32, i32
  }
  func.func @transform_1(%arg0: i32, %arg1: i32) -> (i32, i32, i32) {
    %c0_i32 = arith.constant 0 : i32
    %c0_i32_0 = arith.constant 0 : i32
    %c0_i32_1 = arith.constant 0 : i32
    return %arg0, %c0_i32, %c0_i32_0 : i32, i32, i32
  }
  func.func @transform_2(%arg0: i32, %arg1: i32) -> (i32, i32, i32) {
    %c0_i32 = arith.constant 0 : i32
    %c0_i32_0 = arith.constant 0 : i32
    %c0_i32_1 = arith.constant 0 : i32
    return %arg0, %c0_i32, %c0_i32_0 : i32, i32, i32
  }
  func.func @transform_3(%arg0: i32, %arg1: i32) -> (i32, i32, i32) {
    %c0_i32 = arith.constant 0 : i32
    %c0_i32_0 = arith.constant 0 : i32
    return %arg0, %c0_i32, %arg1 : i32, i32, i32
  }
}

</mosaic_0001>

<bundles_post_ra>
// kernel: tpu_custom_call.1
= control target key start
LH: loop header
LB: loop body
LE: loop exit
PB: predicated region body
PF: predicated region fallthrough
CT: control target
= control target key end

     0   :  { %8 = vsyncpa [#allocation3], 0  ;;  %s794_s0 = inlined_call_operand.hbm [shape: f32[2,4,256], index: 0, kind: input, shape index: {}]   ;;  %s795_s1 = inlined_call_operand.vmem [shape: f32[2,4,4], index: 1, kind: input, shape index: {}]   ;;  %s796_s2 = inlined_call_operand.vmem [shape: f32[2,4,1], index: 2, kind: input, shape index: {}]   ;;  %s797_s3 = inlined_call_operand.hbm [shape: f32[2,4,256], index: 3, kind: output, shape index: {}]  }
   0x1   :  { %10 = vsyncpa [#allocation3 + $0x1], 0 }
   0x2   :  { %11 = vsyncpa [#allocation4], 0 }
   0x3   :  { %13 = vsyncpa [#allocation4 + $0x1], 0  ;;  %s659_s12 = smov 0   ;;  %s661_s13 = smov 0  }
   0x4   :  { %s663_s14 = smov 0   ;;  %s665_s15 = smov 0  }
   0x5   :  { %s667_s16 = smov 0   ;;  %s669_s17 = smov 0  }
   0x6 LB: > { %s437_s18 = sadd.s32 4294967295, %s636_s17   ;;  %s438_s19 = sadd.s32 4294967294, %s636_s17   ;;  %s636_s17 = sphi %s669_s17, %s19_s17   ;;  %s632_s16 = sphi %s667_s16, %s806_s16   ;;  %s628_s15 = sphi %s665_s15, %s805_s15   ;;  %s624_s14 = sphi %s663_s14, %s804_s14   ;;  %s620_s13 = sphi %s661_s13, %s803_s13   ;;  %s616_s12 = sphi %s659_s12, %s802_s12  }
   0x7   : > { %s31_s20 = sadd.s32 1, %s632_s16  ;;  %s40_s21 = sadd.s32 1, %s624_s14 }
   0x8   : > { %p33_p0 = scmp.ge.s32.totalorder %s31_s20, 2  ;;  %p47_p1 = scmp.ne.s32.totalorder %s624_s14, %s620_s13 }
   0x9   : > { %p48_p2 = scmp.eq.s32.totalorder %s636_s17, 0  ;;  %p53_p3 = scmp.ne.s32.totalorder %s620_s13, %s616_s12 }
   0xa   : > { %s808_s20 = smov (%p33_p0, %s31_s20), 0  ;;  %p54_p5 = scmp.eq.s32.totalorder %s437_s18, 0 }
   0xb   : > { %p700_p4 = por %p48_p2, %p47_p1  ;;  %s35_s23 = ssub.s32 %s632_s16, %s808_s20 }
   0xc   : > { %p131_p6 = scmp.eq.s32.totalorder %s437_s18, 1  ;;  %p38_p7 = scmp.eq.s32.totalorder %s35_s23, 0 }
   0xd   : > { %p706_p8 = por %p54_p5, %p53_p3  ;;  %p137_p10 = scmp.eq.s32.totalorder %s438_s19, 1 }
   0xe   : > { %p710_p9 = por %p131_p6, %p47_p1  ;;  %p440_p12 = scmp.ge.s32.totalorder %s636_s17, 2 }
   0xf   : > { %s715_s26 = scalar_select %p38_p7, %s624_s14, %s40_s21  }
  0x10   : > { %p717_p11 = por %p137_p10, %p53_p3  ;;  %p472_p13 = scmp.lt.s32.totalorder %s636_s17, 2 }
  0x11   : > { %s157_s28 = sand.u32 1, %s624_s14   ;;  %s458_s30 = sshll.u32 %s632_s16, 3 }
  0x12   : > { %s441_s29 = sshll.u32 %s157_s28, 3  ;;  %s168_s6 = scalar_lea.hbm %s794_s0, %s458_s30 }
  0x13   : > { %s161_s7 = scalar_lea.vmem [#allocation2], %s441_s29  ;;  %s170_s9 = sshll.u32 %s168_s6, 4  ;;  %s171_s9 = int_to_ptr.hbm [resolvable:$true] %s170_s9 }
  0x14   : > { %s172_s8 = sshll.u32 %s161_s7, 4  ;;  %p465_p0 = pnand %p472_p13, %p700_p4  ;;  %s173_s8 = int_to_ptr.vmem [resolvable:$true] %s172_s8 }
  0x15   : > { %p444_p1 = scmp.ge.s32.totalorder %s636_s17, 1  ;;  %p191_p2 = scmp.lt.s32.totalorder %s636_s17, 3 }
  0x16   : > { %s158_s10 = scalar_lea.sflag [#allocation3], %s157_s28 }
  0x17   : > { %467 = dma.hbm_to_vmem [thread:$0]  (!%p465_p0), %s171_s9, 128, %s173_s8, %s158_s10  }
  0x18   : > { %p192_p3 = pnand %p444_p1, %p191_p2 }
  0x19   : > { %s733_s11 = sand.u32 (!%p192_p3), 1, %s620_s13  }
  0x1a   : > { %195 = sbr.rel (%p192_p3) target bundleno = 176 (0xb0), region = 32  ;;  %s445_s18 = sshll.u32 (!%p192_p3), %s733_s11, 3 }
  0x1b   : > { %s198_s19 = scalar_lea.sflag (!%p192_p3), [#allocation3], %s733_s11  ;;  %s201_s21 = scalar_lea.vmem (!%p192_p3), [#allocation2], %s445_s18 }
  0x1f   : > { %607 = dma.done.wait (%p706_p8), %s198_s19, 128  }
  0x20   : > { %609 = vsyncadd (%p706_p8), %s198_s19, 4294967168  ;;  %p234_p4 = scmp.lt.s32.totalorder %s628_s15, 1  ;;  %v638_v0 = vmov 0   ;;  %v243_v1 = vld [vmem:[%s201_s21] sm:$0xff]  ;;  %vm259_vm0 = vcmask 1043456   ;;  %vm255_vm1 = vcmask 31744  }
  0x21   : > { %523 = vset.pattern.permute.xlu0 %v638_v0  ;;  %252 = vst [vmem:[#allocation1] ss:$2 sm:$0xff] %v243_v1  ;;  %s459_s6 = sshll.u32 %s628_s15, 3  ;;  %s232_s10 = scalar_lea.vmem [#allocation5], %s445_s18 }
  0x22   : > { %s235_s22 = scalar_select %p234_p4, %s628_s15, 1 }
  0x23   : > { %s324_s9 = scalar_lea.hbm %s797_s3, %s459_s6  ;;  %s326_s19 = sshll.u32 %s232_s10, 4  ;;  %s327_s19 = int_to_ptr.vmem [resolvable:$true] %s326_s19 }
  0x24   : > { %s447_s23 = sshll.u32 %s235_s22, 2  ;;  %s328_s21 = sshll.u32 %s324_s9, 4  ;;  %s329_s21 = int_to_ptr.hbm [resolvable:$true] %s328_s21 }
  0x25   : > { %s241_s30 = scalar_lea.vmem %s796_s2, %s447_s23  ;;  %s237_s24 = scalar_lea.vmem %s795_s1, %s447_s23 }
  0x26   : > { %v245_v2 = vld [vmem:[%s241_s30] sm:$0xf]  ;;  %s311_s15 = scalar_lea.sflag [#allocation4], %s733_s11  ;;  %s568_s22 = sshra.s32 %s329_s21, 4  ;;  %s569_s22 = int_to_ptr.hbm [resolvable:$true] %s568_s22 }
  0x27   : > { %248 = vperm.xlu0 %523, %v245_v2   ;;  %v244_v3 = vld [vmem:[%s237_s24] sm:$0xf]  ;;  %s570_s23 = scalar_lea.hbm %s569_s22, 8  ;;  %s574_s18 = scalar_lea.hbm %s797_s3, 16 }
  0x28   : > { %v253_v4 = vld.sshfl [vmem:[#allocation1] sm:$0xff pattern:$0x75316420]  ;;  %v254_v5 = vld.sshfl [vmem:[#allocation1 + $0x8] sm:$0xff pattern:$0x75316420]  ;;  %p571_p5 = scmp.ne.s32.totalorder %s569_s22, %s570_s23  ;;  %p575_p8 = scmp.lt.s32.totalorder %s569_s22, %s797_s3 }
  0x29   : > { %449 = vmatpush.msk.msra.mxu0 %vm259_vm0, %v253_v4  ;;  %451 = vmatpush.msk.msra.mxu1 %vm259_vm0, %v254_v5  ;;  %p576_p10 = scmp.lt.s32.totalorder %s574_s18, %s570_s23 }
  0x2a   : > { %450 = vmatmul.msk.f32.vlgmr.msra.gmra.mxu0 %vm255_vm1, %v244_v3  ;;  %452 = vmatmul.msk.f32.vlgmr.msra.gmra.mxu1 %vm255_vm1, %v244_v3  ;;  %p572_p6 = pnand %p571_p5, %p710_p9 }
  0x2b   : > { %p577_p13 = por %p576_p10, %p575_p8 }
  0x2c   : > { %p573_p7 = pneg %p572_p6 }
  0x2e   : > { %p578_p0 = pnand %p577_p13, %p573_p7 }
  0x99   : > { %v249_v6 = vpop.permute.xlu0 %248 }
  0xa7   : > { %v281_v7 = vpop.f32.mrf.mxu0  ;;  %v301_v8 = vpop.f32.mrf.mxu1 }
  0xa8   : > { %v302_v9 = vadd.f32 %v301_v8, %v249_v6  ;;  %v282_v10 = vadd.f32 %v281_v7, %v249_v6 }
  0xaa   : > { %v306_v11 = vrot.slane %v302_v9, 4 }
  0xac   : > { %v307_v12 = vsel %vm259_vm0, %v282_v10, %v306_v11 }
  0xad   : > { %309 = vst [vmem:[%s232_s10] sm:$0xff] %v307_v12 }
  0xae   : > { %581 = shalt.err (!%p578_p0)
}
  0xaf   : > { %462 = dma.vmem_to_hbm [thread:$0]  (%p710_p9), %s327_s19, 128, %s329_s21, %s311_s15  }
  0xb0 PF: > { %s340_s11 = sand.u32 1, %s616_s12   ;;  %p469_p1 = pnand %p440_p12, %p717_p11 }
  0xb1   : > { %s341_s5 = scalar_lea.sflag [#allocation4], %s340_s11 }
  0xb2   : > { %p470_p2 = pneg %p469_p1 }
  0xb4   : > { %611 = dma.done.wait (%p470_p2), %s341_s5, 128  }
  0xb5   : > { %613 = vsyncadd (%p470_p2), %s341_s5, 4294967168  ;;  %s19_s17 = sadd.s32 1, %s636_s17   ;;  %s802_s12 = smov %s620_s13 }
  0xb6   : > { %p16_p3 = scmp.ge.s32.totalorder %s19_s17, 4   ;;  %s803_s13 = smov %s624_s14 }
  0xb7   : > { %s804_s14 = smov %s715_s26  ;;  %s805_s15 = smov %s632_s16 }
  0xb8   : > { %s806_s16 = smov %s808_s20  ;;  %18 = sbr.rel (!%p16_p3) target bundleno = 6 (0x6), region = 83 }
  0xbd   :  { %347 = vsyncpa [#allocation3], 1 }
  0xbe   :  { %349 = vsyncpa [#allocation3 + $0x1], 1 }
  0xbf   :  { %350 = vsyncpa [#allocation4], 1 }
  0xc0   :  { %352 = vsyncpa [#allocation4 + $0x1], 1 }

</bundles_post_ra>
